<compile_context>
chip_gen: v7x
topology: tpu7x:2x2x1
jax: 0.10.0
libtpu: 0.0.40
codegen_flags: <defaults>
</compile_context>

<pallas_src>
import jax
import jax.numpy as jnp
from jax import lax
from jax.experimental import pallas as pl
from jax.experimental.pallas import tpu as pltpu

LANE = 128      # lane-aligned feature padding (fills MXU columns on all gens)
SUBLANE = 8     # sublane-aligned batch tiling


def _round_up(n, m):
    return ((n + m - 1) // m) * m


def _make_mlp_kernel(num_layers):
    """kernel(x, w0, b0, ..., w_{L-1}, b_{L-1}, out).

    x tile: (TILE_B, in_pad) f32.  w_i: (in_pad_i, out_pad_i) bf16 (VMEM-resident).
    b_i: (1, out_pad_i) f32 (resident).  out tile: (TILE_B, out_pad_last) f32.
    Padded lanes/rows are zero and stay exactly zero through every layer.
    """

    def kernel(x_ref, *refs):
        out_ref = refs[-1]
        param_refs = refs[:-1]

        x = x_ref[...].astype(jnp.float32)

        # F.normalize: x / max(||x||_2, 1e-12) == x * rsqrt(max(||x||^2, 1e-24)).
        # Padded lanes are zero, so the squared sum equals the unpadded one.
        sq = jnp.sum(x * x, axis=1, keepdims=True)
        x = x * lax.rsqrt(jnp.maximum(sq, 1e-24))

        for i in range(num_layers):
            w = param_refs[2 * i][...]                           # bf16 (in_pad, out_pad)
            b = param_refs[2 * i + 1][...].astype(jnp.float32)   # f32  (1, out_pad)
            # bf16 MXU inputs, f32 accumulate; elementwise work stays in f32.
            x = jnp.dot(x.astype(jnp.bfloat16), w,
                        preferred_element_type=jnp.float32) + b
            if i < num_layers - 1:
                x = jnp.maximum(x, 0.0)  # ReLU
                # TODO(synk): nn.Dropout is identity here (eval/inference
                # semantics); training-mode dropout (pltpu.prng_random_bits
                # masking) is intentionally not implemented.

        out_ref[...] = x.astype(out_ref.dtype)

    return kernel


def _choose_tile_b(batch, in_pad, out_pad, widest_pad, param_bytes,
                   budget_bytes=24 << 20, max_tile=512):
    """Batch tile sized so resident params + double-buffered x/out tiles +
    activation temporaries stay inside `budget_bytes` (< 32 MiB scoped default,
    comfortably inside v7x's 64 MiB physical VMEM)."""
    per_row = (2 * in_pad * 4        # double-buffered x tile (f32)
               + 2 * out_pad * 4     # double-buffered out tile (f32)
               + 3 * widest_pad * 4)  # activation temporaries (f32 + bf16 copies)
    avail = max(budget_bytes - param_bytes, per_row * SUBLANE)
    tile = (avail // per_row) // SUBLANE * SUBLANE
    tile = int(max(SUBLANE, min(tile, max_tile, _round_up(batch, SUBLANE))))
    return tile


def mlp_forward(x, weights, biases, tile_b=None):
    """x: (B, input_size) f32; weights[i]: (in_i, out_i); biases[i]: (1, out_i).

    Returns (B, 1) f32, matching MLP.forward (eval mode).
    """
    num_layers = len(weights)
    B, in_features = x.shape
    out_features = weights[-1].shape[1]

    # Lane-align every feature width (zero-pad weights/biases once, outside).
    dims = [in_features] + [w.shape[1] for w in weights]
    dims_pad = [_round_up(d, LANE) for d in dims]

    w_pad, b_pad = [], []
    for i, (w, b) in enumerate(zip(weights, biases)):
        wp = jnp.zeros((dims_pad[i], dims_pad[i + 1]), jnp.bfloat16)
        wp = wp.at[: w.shape[0], : w.shape[1]].set(w.astype(jnp.bfloat16))
        bp = jnp.zeros((1, dims_pad[i + 1]), jnp.float32)
        bp = bp.at[:, : b.shape[-1]].set(b.reshape(1, -1).astype(jnp.float32))
        w_pad.append(wp)
        b_pad.append(bp)

    param_bytes = sum(w.size * 2 for w in w_pad) + sum(b.size * 4 for b in b_pad)
    if tile_b is None:
        tile_b = _choose_tile_b(B, dims_pad[0], dims_pad[-1], max(dims_pad),
                                param_bytes)
    tile_b = max(SUBLANE, _round_up(tile_b, SUBLANE))
    b_padded = _round_up(B, tile_b)

    x_pad = jnp.zeros((b_padded, dims_pad[0]), jnp.float32)
    x_pad = x_pad.at[:B, :in_features].set(x.astype(jnp.float32))

    kernel = _make_mlp_kernel(num_layers)

    # x is tiled along the batch grid; weights/biases use a constant block index
    # so they are DMA'd once and stay VMEM-resident across all grid steps.
    in_specs = [pl.BlockSpec((tile_b, dims_pad[0]), lambda i: (i, 0))]
    args = [x_pad]
    for wp, bp in zip(w_pad, b_pad):
        in_specs.append(pl.BlockSpec(wp.shape, lambda i: (0, 0)))
        in_specs.append(pl.BlockSpec(bp.shape, lambda i: (0, 0)))
        args.append(wp)
        args.append(bp)

    out_spec = pl.BlockSpec((tile_b, dims_pad[-1]), lambda i: (i, 0))

    fn = pl.pallas_call(
        kernel,
        out_shape=jax.ShapeDtypeStruct((b_padded, dims_pad[-1]), jnp.float32),
        grid=(b_padded // tile_b,),
        in_specs=in_specs,
        out_specs=out_spec,
        compiler_params=pltpu.CompilerParams(
            dimension_semantics=("parallel",),   # batch axis splits across cores
            vmem_limit_bytes=32 * 1024 * 1024,
        ),
    )
    out_padded = fn(*args)
    return out_padded[:B, :out_features]


def init_mlp_params(key, input_size, hidden_layer_size):
    """PyTorch-style uniform(+-1/sqrt(fan_in)) init.

    Weights returned pre-transposed as (in, out); biases as (1, out).
    """
    dims = [input_size] + list(hidden_layer_size) + [1]
    weights, biases = [], []
    for i in range(len(dims) - 1):
        fan_in, fan_out = dims[i], dims[i + 1]
        key, kw, kb = jax.random.split(key, 3)
        bound = 1.0 / jnp.sqrt(jnp.array(fan_in, jnp.float32))
        w = jax.random.uniform(kw, (fan_in, fan_out), jnp.float32, -bound, bound)
        b = jax.random.uniform(kb, (1, fan_out), jnp.float32, -bound, bound)
        weights.append(w)
        biases.append(b)
    return weights, biases


def mlp_reference(x, weights, biases):
    """Plain-JAX f32 reference (eval-mode dropout), matching the PyTorch module."""
    norm = jnp.sqrt(jnp.sum(x * x, axis=1, keepdims=True))
    h = x / jnp.maximum(norm, 1e-12)
    n = len(weights)
    for i, (w, b) in enumerate(zip(weights, biases)):
        h = h @ w + b
        if i < n - 1:
            h = jnp.maximum(h, 0.0)
    return h


if __name__ == "__main__":
    key = jax.random.PRNGKey(0)
    key, kx, kp = jax.random.split(key, 3)

    batch = 40
    input_size = 32
    hidden_layer_size = [32, 16]

    x = jax.random.normal(kx, (batch, input_size), jnp.float32)
    weights, biases = init_mlp_params(kp, input_size, hidden_layer_size)

    # Force tile_b=16 so the test exercises a multi-step batch grid (grid=(3,))
    # with resident weights and a padded tail tile.
    out = mlp_forward(x, weights, biases, tile_b=16)
    out = jax.block_until_ready(out)

    ref = mlp_reference(x, weights, biases)
    assert out.shape == (batch, 1), out.shape
    # bf16 MXU inputs -> relaxed tolerance vs. the f32 reference.
    assert jnp.allclose(out, ref, atol=2e-2, rtol=2e-2), (
        "mismatch", float(jnp.max(jnp.abs(out - ref))))

    print("KERNEL_OK")
</pallas_src>

<mosaic_0001>
module attributes {stable_mosaic.version = 11 : i64} {
  func.func @kernel(%arg0: i32, %arg1: memref<16x128xf32, #tpu.memory_space<vmem>>, %arg2: memref<128x128xbf16, #tpu.memory_space<vmem>>, %arg3: memref<1x128xf32, #tpu.memory_space<vmem>>, %arg4: memref<128x128xbf16, #tpu.memory_space<vmem>>, %arg5: memref<1x128xf32, #tpu.memory_space<vmem>>, %arg6: memref<128x128xbf16, #tpu.memory_space<vmem>>, %arg7: memref<1x128xf32, #tpu.memory_space<vmem>>, %arg8: memref<16x128xf32, #tpu.memory_space<vmem>>) attributes {dimension_semantics = [#tpu.dimension_semantics<parallel>], iteration_bounds = array<i64: 3>, scalar_prefetch = 0 : i64, scratch_operands = 0 : i64, tpu.core_type = #tpu.core_type<tc>, window_params = [{transform_indices = @transform_0, window_bounds = array<i64: 16, 128>}, {pipeline_mode = #tpu.pipeline_mode<synchronous>, transform_indices = @transform_1, window_bounds = array<i64: 128, 128>}, {pipeline_mode = #tpu.pipeline_mode<synchronous>, transform_indices = @transform_2, window_bounds = array<i64: 1, 128>}, {pipeline_mode = #tpu.pipeline_mode<synchronous>, transform_indices = @transform_3, window_bounds = array<i64: 128, 128>}, {pipeline_mode = #tpu.pipeline_mode<synchronous>, transform_indices = @transform_4, window_bounds = array<i64: 1, 128>}, {pipeline_mode = #tpu.pipeline_mode<synchronous>, transform_indices = @transform_5, window_bounds = array<i64: 128, 128>}, {pipeline_mode = #tpu.pipeline_mode<synchronous>, transform_indices = @transform_6, window_bounds = array<i64: 1, 128>}, {transform_indices = @transform_7, window_bounds = array<i64: 16, 128>}]} {
    %c0 = arith.constant 0 : index
    %c0_0 = arith.constant 0 : index
    %0 = vector.load %arg1[%c0, %c0_0] : memref<16x128xf32, #tpu.memory_space<vmem>>, vector<16x128xf32>
    %1 = arith.mulf %0, %0 : vector<16x128xf32>
    %cst = arith.constant dense<0.000000e+00> : vector<16xf32>
    %2 = vector.multi_reduction <add>, %1, %cst [1] : vector<16x128xf32> to vector<16xf32>
    %3 = vector.shape_cast %2 : vector<16xf32> to vector<16x1xf32>
    %cst_1 = arith.constant 1.000000e-24 : f32
    %4 = vector.broadcast %cst_1 : f32 to vector<16x1xf32>
    %5 = arith.maximumf %3, %4 : vector<16x1xf32>
    %6 = math.rsqrt %5 : vector<16x1xf32>
    %7 = vector.broadcast %6 : vector<16x1xf32> to vector<16x128xf32>
    %8 = arith.mulf %0, %7 : vector<16x128xf32>
    %c0_2 = arith.constant 0 : index
    %c0_3 = arith.constant 0 : index
    %9 = vector.load %arg2[%c0_2, %c0_3] : memref<128x128xbf16, #tpu.memory_space<vmem>>, vector<128x128xbf16>
    %c0_4 = arith.constant 0 : index
    %c0_5 = arith.constant 0 : index
    %10 = vector.load %arg3[%c0_4, %c0_5] : memref<1x128xf32, #tpu.memory_space<vmem>>, vector<1x128xf32>
    %11 = arith.truncf %8 : vector<16x128xf32> to vector<16x128xbf16>
    %cst_6 = arith.constant dense<0.000000e+00> : vector<16x128xf32>
    %12 = tpu.matmul %11, %9, %cst_6 {dimension_numbers = #tpu.dot_dimension_numbers<[1], [0], [0], [1], [0, 0, 1, 1], [], []>} : vector<16x128xbf16>, vector<128x128xbf16>, vector<16x128xf32> -> vector<16x128xf32>
    %13 = vector.broadcast %10 : vector<1x128xf32> to vector<16x128xf32>
    %14 = arith.addf %12, %13 : vector<16x128xf32>
    %cst_7 = arith.constant 0.000000e+00 : f32
    %15 = vector.broadcast %cst_7 : f32 to vector<16x128xf32>
    %16 = arith.maximumf %14, %15 : vector<16x128xf32>
    %c0_8 = arith.constant 0 : index
    %c0_9 = arith.constant 0 : index
    %17 = vector.load %arg4[%c0_8, %c0_9] : memref<128x128xbf16, #tpu.memory_space<vmem>>, vector<128x128xbf16>
    %c0_10 = arith.constant 0 : index
    %c0_11 = arith.constant 0 : index
    %18 = vector.load %arg5[%c0_10, %c0_11] : memref<1x128xf32, #tpu.memory_space<vmem>>, vector<1x128xf32>
    %19 = arith.truncf %16 : vector<16x128xf32> to vector<16x128xbf16>
    %cst_12 = arith.constant dense<0.000000e+00> : vector<16x128xf32>
    %20 = tpu.matmul %19, %17, %cst_12 {dimension_numbers = #tpu.dot_dimension_numbers<[1], [0], [0], [1], [0, 0, 1, 1], [], []>} : vector<16x128xbf16>, vector<128x128xbf16>, vector<16x128xf32> -> vector<16x128xf32>
    %21 = vector.broadcast %18 : vector<1x128xf32> to vector<16x128xf32>
    %22 = arith.addf %20, %21 : vector<16x128xf32>
    %cst_13 = arith.constant 0.000000e+00 : f32
    %23 = vector.broadcast %cst_13 : f32 to vector<16x128xf32>
    %24 = arith.maximumf %22, %23 : vector<16x128xf32>
    %c0_14 = arith.constant 0 : index
    %c0_15 = arith.constant 0 : index
    %25 = vector.load %arg6[%c0_14, %c0_15] : memref<128x128xbf16, #tpu.memory_space<vmem>>, vector<128x128xbf16>
    %c0_16 = arith.constant 0 : index
    %c0_17 = arith.constant 0 : index
    %26 = vector.load %arg7[%c0_16, %c0_17] : memref<1x128xf32, #tpu.memory_space<vmem>>, vector<1x128xf32>
    %27 = arith.truncf %24 : vector<16x128xf32> to vector<16x128xbf16>
    %cst_18 = arith.constant dense<0.000000e+00> : vector<16x128xf32>
    %28 = tpu.matmul %27, %25, %cst_18 {dimension_numbers = #tpu.dot_dimension_numbers<[1], [0], [0], [1], [0, 0, 1, 1], [], []>} : vector<16x128xbf16>, vector<128x128xbf16>, vector<16x128xf32> -> vector<16x128xf32>
    %29 = vector.broadcast %26 : vector<1x128xf32> to vector<16x128xf32>
    %30 = arith.addf %28, %29 : vector<16x128xf32>
    %c0_19 = arith.constant 0 : index
    %c0_20 = arith.constant 0 : index
    %31 = vector.load %arg8[%c0_19, %c0_20] : memref<16x128xf32, #tpu.memory_space<vmem>>, vector<16x128xf32>
    tpu.vector_store %arg8[%c0_19, %c0_20], %30 {strides = array<i32>} : memref<16x128xf32, #tpu.memory_space<vmem>>, vector<16x128xf32>,
    return
  }
  func.func @transform_0(%arg0: i32) -> (i32, i32) {
    %c0_i32 = arith.constant 0 : i32
    %c0_i32_0 = arith.constant 0 : i32
    return %arg0, %c0_i32 : i32, i32
  }
  func.func @transform_1(%arg0: i32) -> (i32, i32) {
    %c0_i32 = arith.constant 0 : i32
    %c0_i32_0 = arith.constant 0 : i32
    %c0_i32_1 = arith.constant 0 : i32
    return %c0_i32, %c0_i32_0 : i32, i32
  }
  func.func @transform_2(%arg0: i32) -> (i32, i32) {
    %c0_i32 = arith.constant 0 : i32
    %c0_i32_0 = arith.constant 0 : i32
    %c0_i32_1 = arith.constant 0 : i32
    return %c0_i32, %c0_i32_0 : i32, i32
  }
  func.func @transform_3(%arg0: i32) -> (i32, i32) {
    %c0_i32 = arith.constant 0 : i32
    %c0_i32_0 = arith.constant 0 : i32
    %c0_i32_1 = arith.constant 0 : i32
    return %c0_i32, %c0_i32_0 : i32, i32
  }
  func.func @transform_4(%arg0: i32) -> (i32, i32) {
    %c0_i32 = arith.constant 0 : i32
    %c0_i32_0 = arith.constant 0 : i32
    %c0_i32_1 = arith.constant 0 : i32
    return %c0_i32, %c0_i32_0 : i32, i32
  }
  func.func @transform_5(%arg0: i32) -> (i32, i32) {
    %c0_i32 = arith.constant 0 : i32
    %c0_i32_0 = arith.constant 0 : i32
    %c0_i32_1 = arith.constant 0 : i32
    return %c0_i32, %c0_i32_0 : i32, i32
  }
  func.func @transform_6(%arg0: i32) -> (i32, i32) {
    %c0_i32 = arith.constant 0 : i32
    %c0_i32_0 = arith.constant 0 : i32
    %c0_i32_1 = arith.constant 0 : i32
    return %c0_i32, %c0_i32_0 : i32, i32
  }
  func.func @transform_7(%arg0: i32) -> (i32, i32) {
    %c0_i32 = arith.constant 0 : i32
    %c0_i32_0 = arith.constant 0 : i32
    return %arg0, %c0_i32 : i32, i32
  }
}

</mosaic_0001>

<bundles_post_ra>
// kernel: tpu_custom_call.1
= control target key start
LH: loop header
LB: loop body
LE: loop exit
PB: predicated region body
PF: predicated region fallthrough
CT: control target
= control target key end

     0   :  { %12 = vsyncpa [#allocation3], 0  ;;  %s1620_s0 = inlined_call_operand.hbm [shape: f32[48,128], index: 0, kind: input, shape index: {}]   ;;  %s1621_s1 = inlined_call_operand.hbm [shape: bf16[128,128], index: 1, kind: input, shape index: {}]   ;;  %s1622_s2 = inlined_call_operand.vmem [shape: f32[1,128], index: 2, kind: input, shape index: {}]   ;;  %s1623_s3 = inlined_call_operand.hbm [shape: bf16[128,128], index: 3, kind: input, shape index: {}]   ;;  %s1624_s4 = inlined_call_operand.vmem [shape: f32[1,128], index: 4, kind: input, shape index: {}]   ;;  %s1625_s5 = inlined_call_operand.hbm [shape: bf16[128,128], index: 5, kind: input, shape index: {}]   ;;  %s1626_s6 = inlined_call_operand.vmem [shape: f32[1,128], index: 6, kind: input, shape index: {}]   ;;  %s1627_s7 = inlined_call_operand.hbm [shape: f32[48,128], index: 7, kind: output, shape index: {}]  }
   0x1   :  { %14 = vsyncpa [#allocation3 + $0x1], 0 }
   0x2   :  { %15 = vsyncpa [#allocation6], 0 }
   0x3   :  { %16 = vsyncpa [#allocation9], 0 }
   0x4   :  { %17 = vsyncpa [#allocation4], 0 }
   0x5   :  { %19 = vsyncpa [#allocation4 + $0x1], 0  ;;  %s1311_s24 = smov 0   ;;  %s1313_s25 = smov 0  }
   0x6   :  { %s1315_s26 = smov 0   ;;  %s1317_s27 = smov 0  }
   0x7 LB: > { %s1332_s28 = sadd.s32 4294967295, %s1256_s27   ;;  %s819_s29 = sadd.s32 4294967294, %s1256_s27   ;;  %s1256_s27 = sphi %s1317_s27, %s1652_s27   ;;  %s1252_s26 = sphi %s1315_s26, %s1651_s26   ;;  %s1248_s25 = sphi %s1313_s25, %s1650_s25   ;;  %s1244_s24 = sphi %s1311_s24, %s1649_s24  }
   0x8   : > { %p45_p0 = scmp.ne.s32.totalorder %s1248_s25, %s1244_s24  ;;  %p1628_p1 = scmp.eq.s32.totalorder %s1332_s28, 0 }
   0x9   : > { %p201_p3 = scmp.eq.s32.totalorder %s819_s29, 2  ;;  %p820_p5 = scmp.ge.s32.totalorder %s1256_s27, 1 }
   0xa   : > { %p1341_p4 = por %p1628_p1, %p45_p0  ;;  %p208_p7 = scmp.lt.s32.totalorder %s1256_s27, 4 }
   0xb   : > { %p1346_p6 = por %p201_p3, %p45_p0  ;;  %s1258_s10 = smov [#allocation5]  }
   0xc   : > { %s1632_s30 = scalar_select %p1341_p4, 1, 0 }
   0xd   : > { %s1633_s8 = scalar_select %p1346_p6, 1, 0 }
   0xe   : > { %p1351_p8 = pnand %p820_p5, %p208_p7  ;;  %s220_s11 = sshll.u32 %s1258_s10, 4  ;;  %s1355_s11 = int_to_ptr.vmem [resolvable:$true] %s220_s11 }
   0xf   : > { %1634 = sst [smem:[#allocation15_spill]] %s1633_s8  ;;  %s1259_s13 = smov [#allocation7]  }
  0x10   : > { %s1635_s9 = scalar_select %p1351_p8, 1, 0 }
  0x11   : > { %p971_p9 = pneg %p1351_p8  ;;  %s236_s14 = sshll.u32 %s1259_s13, 4  ;;  %s1365_s14 = int_to_ptr.vmem [resolvable:$true] %s236_s14 }
  0x12   : > { %s1260_s15 = smov [#allocation8]   ;;  %s1068_s19 = scalar_lea.hbm %s1621_s1, 1024 }
  0x13   : > { %p1361_p10 = pnand %p971_p9, %p1628_p1  ;;  %s1367_s16 = sshll.u32 %s1260_s15, 4  ;;  %s253_s16 = int_to_ptr.vmem [resolvable:$true] %s1367_s16 }
  0x14   : > { %p1069_p11 = scmp.ne.s32.totalorder %s1621_s1, %s1068_s19  ;;  %p1075_p3 = scmp.lt.u32.totalorder %s1068_s19, %s1621_s1 }
  0x15   : > { %p1377_p12 = pneg %p1361_p10 }
  0x17   : > { %p1071_p13 = pnand %p1377_p12, %p1069_p11 }
  0x19   : > { %p1072_p0 = pneg %p1071_p13 }
  0x1b   : > { %p1077_p5 = pnand %p1075_p3, %p1072_p0 }
  0x1d   : > { %1080 = shalt.err (!%p1077_p5)
}
  0x1e   : > { %s1081_s10 = scalar_lea.vmem %s1355_s11, 1024  ;;  %p1089_p2 = scmp.lt.s32.totalorder %s1355_s11, %s1355_s11 }
  0x1f   : > { %p1082_p7 = scmp.ne.s32.totalorder %s1355_s11, %s1081_s10  ;;  %p1090_p6 = scmp.lt.s32.totalorder %s1081_s10, %s1081_s10 }
  0x21   : > { %p1084_p9 = pnand %p1082_p7, %p1377_p12  ;;  %p1091_p11 = por %p1090_p6, %p1089_p2 }
  0x23   : > { %p1085_p1 = pneg %p1084_p9 }
  0x25   : > { %p1092_p13 = pnand %p1091_p11, %p1085_p1 }
  0x27   : > { %1095 = shalt.err (!%p1092_p13)
}
  0x28   : > { %s1261_s13 = smov 64   ;;  %s1262_s15 = smov 4  }
  0x29   : > { %974 = dma.hbm_to_vmem [thread:$0]  (!%p1361_p10), %s1621_s1, 1024, %s1355_s11, [#allocation6], %s1261_s13, %s1261_s13, %s1262_s15  }
  0x2a   : > { %s1096_s21 = scalar_lea.hbm %s1623_s3, 1024 }
  0x2b   : > { %p1097_p1 = scmp.ne.s32.totalorder %s1623_s3, %s1096_s21  ;;  %p1103_p0 = scmp.lt.u32.totalorder %s1096_s21, %s1623_s3 }
  0x2d   : > { %p1099_p2 = pnand %p1097_p1, %p1377_p12 }
  0x2f   : > { %p1100_p6 = pneg %p1099_p2 }
  0x31   : > { %p1105_p3 = pnand %p1103_p0, %p1100_p6 }
  0x33   : > { %1108 = shalt.err (!%p1105_p3)
}
  0x34   : > { %s1109_s11 = scalar_lea.vmem %s1365_s14, 1024  ;;  %p1117_p11 = scmp.lt.s32.totalorder %s1365_s14, %s1365_s14 }
  0x35   : > { %p1110_p5 = scmp.ne.s32.totalorder %s1365_s14, %s1109_s11  ;;  %p1118_p13 = scmp.lt.s32.totalorder %s1109_s11, %s1109_s11 }
  0x37   : > { %p1112_p7 = pnand %p1110_p5, %p1377_p12  ;;  %p1119_p1 = por %p1118_p13, %p1117_p11 }
  0x39   : > { %p1113_p9 = pneg %p1112_p7 }
  0x3b   : > { %p1120_p2 = pnand %p1119_p1, %p1113_p9 }
  0x3d   : > { %1123 = shalt.err (!%p1120_p2)
}
  0x3e   : > { %977 = dma.hbm_to_vmem [thread:$0]  (!%p1361_p10), %s1623_s3, 1024, %s1365_s14, [#allocation6], %s1261_s13, %s1261_s13, %s1262_s15  }
  0x3f   : > { %s1124_s20 = scalar_lea.hbm %s1625_s5, 1024 }
  0x40   : > { %p1125_p6 = scmp.ne.s32.totalorder %s1625_s5, %s1124_s20  ;;  %p1131_p5 = scmp.lt.u32.totalorder %s1124_s20, %s1625_s5 }
  0x42   : > { %p1127_p0 = pnand %p1125_p6, %p1377_p12 }
  0x44   : > { %p1128_p3 = pneg %p1127_p0 }
  0x46   : > { %p1133_p7 = pnand %p1131_p5, %p1128_p3 }
  0x48   : > { %1136 = shalt.err (!%p1133_p7)
}
  0x49   : > { %s1137_s11 = scalar_lea.vmem %s253_s16, 1024  ;;  %p1145_p1 = scmp.lt.s32.totalorder %s253_s16, %s253_s16 }
  0x4a   : > { %p1138_p9 = scmp.ne.s32.totalorder %s253_s16, %s1137_s11  ;;  %p1146_p2 = scmp.lt.s32.totalorder %s1137_s11, %s1137_s11 }
  0x4c   : > { %p1140_p11 = pnand %p1138_p9, %p1377_p12  ;;  %p1147_p4 = por %p1146_p2, %p1145_p1 }
  0x4e   : > { %p1141_p13 = pneg %p1140_p11 }
  0x50   : > { %p1148_p8 = pnand %p1147_p4, %p1141_p13 }
  0x52   : > { %1151 = shalt.err (!%p1148_p8)
}
  0x53   : > { %980 = dma.hbm_to_vmem [thread:$0]  (!%p1361_p10), %s1625_s5, 1024, %s253_s16, [#allocation9], %s1261_s13, %s1261_s13, %s1262_s15  }
  0x54   : > { %s1450_s22 = sadd.s32 1, %s1256_s27   ;;  %s32_s17 = sadd.s32 1, %s1252_s26 }
  0x55   : > { %s29_s12 = ssub.s32 %s1256_s27, %s1450_s22  ;;  %p39_p8 = scmp.ne.s32.totalorder %s1252_s26, %s1248_s25 }
  0x56   : > { %p30_p4 = scmp.eq.s32.totalorder %s29_s12, 0  ;;  %p40_p12 = scmp.eq.s32.totalorder %s1256_s27, 0 }
  0x57   : > { %p992_p6 = scmp.lt.s32.totalorder %s1256_s27, 3  ;;  %p1638_p3 = scmp.eq.s32.totalorder %s1332_s28, 2 }
  0x58   : > { %s1460_s18 = scalar_select %p30_p4, %s1252_s26, %s32_s17  }
  0x59   : > { %p41_p0 = por %p40_p12, %p39_p8  ;;  %p1464_p5 = por %p1638_p3, %p39_p8 }
  0x5a   : > { %s269_s20 = sand.u32 1, %s1252_s26   ;;  %s866_s21 = sshll.u32 %s1256_s27, 8 }
  0x5b   : > { %s825_s16 = sshll.u32 %s269_s20, 4  ;;  %s1473_s23 = scalar_lea.hbm %s1620_s0, %s866_s21 }
  0x5c   : > { %s273_s29 = scalar_lea.vmem [#allocation2], %s825_s16  ;;  %p1475_p10 = pnand %p992_p6, %p41_p0 }
  0x5d   : > { %s280_s10 = sshll.u32 %s273_s29, 4  ;;  %s1481_s14 = scalar_lea.sflag [#allocation3], %s269_s20  ;;  %s1479_s10 = int_to_ptr.vmem [resolvable:$true] %s280_s10 }
  0x5e   : > { %s1152_s8 = scalar_lea.hbm %s1473_s23, 256  ;;  %p1154_p9 = pneg %p1475_p10 }
  0x5f   : > { %p1153_p7 = scmp.ne.s32.totalorder %s1473_s23, %s1152_s8  ;;  %s1157_s21 = scalar_lea.hbm %s1620_s0, 768 }
  0x60   : > { %p1158_p1 = scmp.lt.u32.totalorder %s1473_s23, %s1620_s0  ;;  %p1159_p2 = scmp.lt.u32.totalorder %s1157_s21, %s1152_s8 }
  0x61   : > { %p1155_p11 = pnand %p1154_p9, %p1153_p7  ;;  %p1161_p8 = scmp.lt.u32.totalorder %s1152_s8, %s1473_s23 }
  0x62   : > { %p1160_p4 = por %p1159_p2, %p1158_p1 }
  0x63   : > { %p1156_p13 = pneg %p1155_p11 }
  0x64   : > { %p1162_p12 = por %p1161_p8, %p1160_p4 }
  0x66   : > { %p1163_p6 = pnand %p1162_p12, %p1156_p13 }
  0x68   : > { %1166 = shalt.err (!%p1163_p6)
}
  0x69   : > { %s1167_s20 = scalar_lea.vmem %s1479_s10, 256  ;;  %s1263_s15 = smov [#allocation2]  }
  0x6a   : > { %p1168_p0 = scmp.ne.s32.totalorder %s1479_s10, %s1167_s20  ;;  %s1172_s29 = sshll.u32 %s1263_s15, 4  ;;  %s1173_s29 = int_to_ptr.vmem [resolvable:$false] %s1172_s29 }
  0x6b   : > { %s1174_s12 = scalar_lea.vmem %s1173_s29, 512  ;;  %p1175_p11 = scmp.lt.s32.totalorder %s1479_s10, %s1173_s29 }
  0x6c   : > { %p1170_p3 = pnand %p1168_p0, %p1154_p9  ;;  %p1176_p1 = scmp.lt.s32.totalorder %s1174_s12, %s1167_s20 }
  0x6e   : > { %p1171_p7 = pneg %p1170_p3  ;;  %p1177_p2 = por %p1176_p1, %p1175_p11 }
  0x70   : > { %p1178_p4 = pnand %p1177_p2, %p1171_p7 }
  0x72   : > { %1181 = shalt.err (!%p1178_p4)
}
  0x73   : > { %s1264_s8 = smov 128   ;;  %s1265_s17 = smov 8  }
  0x74   : > { %984 = dma.hbm_to_vmem [thread:$0]  (!%p1475_p10), %s1473_s23, 256, %s1479_s10, %s1481_s14, %s1264_s8, %s1264_s8, %s1265_s17  }
  0x75   : > { %p1641_p9 = scmp.ne.s32.totalorder %s1635_s9, 0 }
  0x76   : > { %s1512_s21 = sand.u32 (!%p1641_p9), 1, %s1248_s25   ;;  %p1642_p13 = scmp.ne.s32.totalorder (!%p1641_p9), %s1632_s30, 0 }
  0x77   : > { %292 = sbr.rel (%p1641_p9) target bundleno = 971 (0x3cb), region = 48  ;;  %s829_s16 = sshll.u32 (!%p1641_p9), %s1512_s21, 4 }
  0x78   : > { %s295_s13 = scalar_lea.sflag (!%p1641_p9), [#allocation3], %s1512_s21  ;;  %s298_s20 = scalar_lea.vmem (!%p1641_p9), [#allocation2], %s829_s16 }
  0x7e   : > { %1227 = dma.done.wait (%p1642_p13), %s295_s13, 256  }
  0x7f   : > { %1229 = vsyncadd (%p1642_p13), %s295_s13, 4294967040  ;;  %p1643_p10 = scmp.eq.s32.totalorder %s1332_s28, 0 }
  0x81   : > { %1231 = dma.done.wait (%p1643_p10), [#allocation6], 2048   ;;  %p1644_p8 = pmov %p1643_p10 }
  0x83   : > { %1233 = vsyncadd (%p1644_p8), [#allocation6], 4294965248  ;;  %p1645_p12 = pmov %p1644_p8 }
  0x84   : > { %p1646_p6 = pmov %p1644_p8 }
  0x85   : > { %1235 = dma.done.wait (%p1645_p12), [#allocation9], 1024  }
  0x86   : > { %1237 = vsyncadd (%p1646_p6), [#allocation9], 4294966272  ;;  %v1266_v0 = vmov 0.0   ;;  %v344_v1 = vld [vmem:[%s298_s20] sm:$0xff]  ;;  %v345_v2 = vld [vmem:[%s298_s20 + $0x8] sm:$0xff]  ;;  %vm1267_vm0 = vmmov 0  }
  0x87   : > { %895 = vmatprep.subr.bf16.mxu0 %v1266_v0  ;;  %915 = vmatprep.subr.bf16.mxu1 %v1266_v0  ;;  %v346_v3 = vmul.f32 %v344_v1, %v344_v1  ;;  %v1040_v4 = vld [vmem:[#allocation5] sm:$0xff]   ;;  %v347_v5 = vmul.f32 %v345_v2, %v345_v2  ;;  %v1041_v6 = vld [vmem:[#allocation5 + $0x8] sm:$0xff]   ;;  %v1042_v7 = vld [vmem:[#allocation5 + $0x10] sm:$0xff]   ;;  %s340_s15 = scalar_lea.vmem [#allocation10], %s829_s16  ;;  %s867_s12 = sshll.u32 %s1332_s28, 8 }
  0x88   : > { %896 = vmatpush3.bf16.msra.mxu0 %v1040_v4  ;;  %v1043_v8 = vld [vmem:[#allocation5 + $0x18] sm:$0xff]   ;;  %v1044_v9 = vld [vmem:[#allocation5 + $0x20] sm:$0xff]   ;;  %v1045_v10 = vld [vmem:[#allocation5 + $0x28] sm:$0xff]   ;;  %911 = vmatprep.mubr.msk.bf16.mxu0 %vm1267_vm0, %v1266_v0  ;;  %s717_s29 = sshll.u32 %s340_s15, 4  ;;  %s1577_s13 = scalar_lea.hbm %s1627_s7, %s867_s12  ;;  %s1572_s29 = int_to_ptr.vmem [resolvable:$true] %s717_s29 }
  0x89   : > { %348 = vadd.xlane.f32.xlu0 %v346_v3  ;;  %897 = vmatprep.subr.bf16.mxu0 %v1266_v0  ;;  %v1046_v11 = vld [vmem:[#allocation5 + $0x30] sm:$0xff]   ;;  %v1047_v12 = vld [vmem:[#allocation5 + $0x38] sm:$0xff]   ;;  %v1048_v13 = vld [vmem:[#allocation7] sm:$0xff]   ;;  %s704_s16 = scalar_lea.sflag [#allocation4], %s1512_s21  ;;  %s1182_s28 = scalar_lea.vmem %s1572_s29, 256 }
  0x8a   : > { %931 = vmatprep.mubr.msk.bf16.mxu1 %vm1267_vm0, %v1266_v0  ;;  %916 = vmatpush3.bf16.msra.mxu1 %v1048_v13  ;;  %v1049_v14 = vld [vmem:[#allocation7 + $0x8] sm:$0xff]   ;;  %v1050_v15 = vld [vmem:[#allocation7 + $0x10] sm:$0xff]   ;;  %v1051_v16 = vld [vmem:[#allocation7 + $0x18] sm:$0xff]   ;;  %p1183_p0 = scmp.ne.s32.totalorder %s1572_s29, %s1182_s28  ;;  %s1268_s20 = smov [#allocation10]  }
  0x8b   : > { %917 = vmatprep.subr.bf16.mxu1 %v1266_v0  ;;  %v1052_v17 = vld [vmem:[#allocation7 + $0x20] sm:$0xff]   ;;  %v1053_v18 = vld [vmem:[#allocation7 + $0x28] sm:$0xff]   ;;  %v1054_v28 = vld [vmem:[#allocation7 + $0x30] sm:$0xff]   ;;  %s1186_s30 = sshll.u32 %s1268_s20, 4  ;;  %s1187_s30 = int_to_ptr.vmem [resolvable:$false] %s1186_s30 }
  0x8c   : > { %898 = vmatpush3.bf16.msra.mxu0 %v1041_v6  ;;  %v1055_v29 = vld [vmem:[#allocation7 + $0x38] sm:$0xff]   ;;  %v1056_v30 = vld [vmem:[#allocation8] sm:$0xff]   ;;  %v1057_v31 = vld [vmem:[#allocation8 + $0x8] sm:$0xff]   ;;  %p1184_p3 = pnand %p1183_p0, %p1464_p5  ;;  %s1188_s9 = scalar_lea.vmem %s1187_s30, 512 }
  0x8d   : > { %350 = vadd.xlane.f32.xlu0 %v347_v5  ;;  %899 = vmatprep.subr.bf16.mxu0 %v1266_v0  ;;  %v1058_v32 = vld [vmem:[#allocation8 + $0x10] sm:$0xff]   ;;  %v1059_v33 = vld [vmem:[#allocation8 + $0x18] sm:$0xff]   ;;  %v1060_v34 = vld [vmem:[#allocation8 + $0x20] sm:$0xff]   ;;  %p1189_p11 = scmp.lt.s32.totalorder %s1572_s29, %s1187_s30  ;;  %p1190_p1 = scmp.lt.s32.totalorder %s1188_s9, %s1182_s28 }
  0x8e   : > { %918 = vmatpush3.bf16.msra.mxu1 %v1049_v14  ;;  %v1061_v35 = vld [vmem:[#allocation8 + $0x28] sm:$0xff]   ;;  %v834_v36 = vld [vmem:[%s1622_s2] ss:$0 sm:$0xff]  ;;  %v1062_v46 = vld [vmem:[#allocation8 + $0x30] sm:$0xff]   ;;  %p1185_p7 = pneg %p1184_p3 }
  0x8f   : > { %919 = vmatprep.subr.bf16.mxu1 %v1266_v0  ;;  %v1063_v47 = vld [vmem:[#allocation8 + $0x38] sm:$0xff]   ;;  %v843_v48 = vld [vmem:[%s1624_s4] ss:$0 sm:$0xff]  ;;  %p1191_p2 = por %p1190_p1, %p1189_p11 }
  0x90   : > { %900 = vmatpush3.bf16.msra.mxu0 %v1042_v7  ;;  %v852_v58 = vld [vmem:[%s1626_s6] ss:$0 sm:$0xff] }
  0x91   : > { %901 = vmatprep.subr.bf16.mxu0 %v1266_v0  ;;  %p1192_p4 = pnand %p1191_p2, %p1185_p7 }
  0x92   : > { %920 = vmatpush3.bf16.msra.mxu1 %v1050_v15 }
  0x93   : > { %921 = vmatprep.subr.bf16.mxu1 %v1266_v0 }
  0x94   : > { %902 = vmatpush3.bf16.msra.mxu0 %v1043_v8 }
  0x95   : > { %903 = vmatprep.subr.bf16.mxu0 %v1266_v0 }
  0x96   : > { %922 = vmatpush3.bf16.msra.mxu1 %v1051_v16 }
  0x97   : > { %923 = vmatprep.subr.bf16.mxu1 %v1266_v0 }
  0x98   : > { %904 = vmatpush3.bf16.msra.mxu0 %v1044_v9 }
  0x99   : > { %905 = vmatprep.subr.bf16.mxu0 %v1266_v0 }
  0x9a   : > { %924 = vmatpush3.bf16.msra.mxu1 %v1052_v17 }
  0x9b   : > { %925 = vmatprep.subr.bf16.mxu1 %v1266_v0 }
  0x9c   : > { %906 = vmatpush3.bf16.msra.mxu0 %v1045_v10 }
  0x9d   : > { %907 = vmatprep.subr.bf16.mxu0 %v1266_v0 }
  0x9e   : > { %926 = vmatpush3.bf16.msra.mxu1 %v1053_v18 }
  0x9f   : > { %927 = vmatprep.subr.bf16.mxu1 %v1266_v0 }
  0xa0   : > { %908 = vmatpush3.bf16.msra.mxu0 %v1046_v11 }
  0xa1   : > { %909 = vmatprep.subr.bf16.mxu0 %v1266_v0 }
  0xa2   : > { %928 = vmatpush3.bf16.msra.mxu1 %v1054_v28 }
  0xa3   : > { %929 = vmatprep.subr.bf16.mxu1 %v1266_v0 }
  0xa4   : > { %910 = vmatpush3.bf16.msra.mxu0 %v1047_v12 }
  0xa5   : > { %935 = vmatprep.subr.bf16.mxu0 %v1266_v0 }
  0xa6   : > { %930 = vmatpush3.bf16.msra.mxu1 %v1055_v29 }
 0x116   : > { %v349_v19 = vpop.xlane.xlu0 %348 }
 0x117   : > { %v352_v20 = vmax.f32 %v349_v19, 1e-24 }
 0x119   : > { %1064 = vrsqrt.f32 %v352_v20 }
 0x11a   : > { %v351_v21 = vpop.xlane.xlu0 %350 }
 0x11b   : > { %v353_v22 = vmax.f32 %v351_v21, 1e-24 }
 0x11d   : > { %1066 = vrsqrt.f32 %v353_v22 }
 0x123   : > { %v1065_v23 = vpop.eup %1064 }
 0x124   : > { %v356_v25 = vmul.f32 %v1065_v23, %v344_v1 }
 0x127   : > { %v1067_v24 = vpop.eup %1066 }
 0x128   : > { %v357_v26 = vmul.f32 %v1067_v24, %v345_v2 }
 0x12a   : > { %v375_v27 = vpack.c.bf16 %v357_v26, %v356_v25 }
 0x12c   : > { %912 = vmatmul.mubr.bf16.vlgmr.msra.gmra.mrb[0].mxu0 %v375_v27 }
 0x12d   : > { %951 = vmatprep.mubr.msk.bf16.mxu0 %vm1267_vm0, %v1266_v0  ;;  %936 = vmatpush3.bf16.msra.mxu0 %v1056_v30 }
 0x12e   : > { %937 = vmatprep.subr.bf16.mxu0 %v1266_v0 }
 0x131   : > { %938 = vmatpush3.bf16.msra.mxu0 %v1057_v31 }
 0x132   : > { %939 = vmatprep.subr.bf16.mxu0 %v1266_v0 }
 0x135   : > { %940 = vmatpush3.bf16.msra.mxu0 %v1058_v32 }
 0x136   : > { %941 = vmatprep.subr.bf16.mxu0 %v1266_v0 }
 0x139   : > { %942 = vmatpush3.bf16.msra.mxu0 %v1059_v33 }
 0x13a   : > { %943 = vmatprep.subr.bf16.mxu0 %v1266_v0 }
 0x13d   : > { %944 = vmatpush3.bf16.msra.mxu0 %v1060_v34 }
 0x13e   : > { %945 = vmatprep.subr.bf16.mxu0 %v1266_v0 }
 0x141   : > { %946 = vmatpush3.bf16.msra.mxu0 %v1061_v35 }
 0x142   : > { %947 = vmatprep.subr.bf16.mxu0 %v1266_v0 }
 0x145   : > { %948 = vmatpush3.bf16.msra.mxu0 %v1062_v46 }
 0x146   : > { %949 = vmatprep.subr.bf16.mxu0 %v1266_v0 }
 0x149   : > { %950 = vmatpush3.bf16.msra.mxu0 %v1063_v47 }
 0x1ff   : > { %v464_v37 = vpop.f32.mrb[0].mxu0 }
 0x200   : > { %v465_v38 = vadd.f32 %v834_v36, %v464_v37  ;;  %v913_v39 = vpop.f32.mrb[1].mxu0 }
 0x201   : > { %v467_v40 = vpop.f32.mrb[2].mxu0 }
 0x202   : > { %v468_v41 = vadd.f32 %v834_v36, %v467_v40  ;;  %v914_v42 = vpop.f32.mrb[3].mxu0  ;;  %v471_v43 = vmax.f32 %v465_v38, 0.0 }
 0x204   : > { %v472_v44 = vmax.f32 %v468_v41, 0.0 }
 0x206   : > { %v490_v45 = vpack.c.bf16 %v472_v44, %v471_v43 }
 0x208   : > { %932 = vmatmul.mubr.bf16.vlgmr.msra.gmra.mrb[0].mxu1 %v490_v45 }
 0x2db   : > { %v579_v49 = vpop.f32.mrb[0].mxu1 }
 0x2dc   : > { %v580_v50 = vadd.f32 %v843_v48, %v579_v49  ;;  %v933_v51 = vpop.f32.mrb[1].mxu1 }
 0x2dd   : > { %v582_v52 = vpop.f32.mrb[2].mxu1 }
 0x2de   : > { %v583_v53 = vadd.f32 %v843_v48, %v582_v52  ;;  %v934_v54 = vpop.f32.mrb[3].mxu1  ;;  %v586_v55 = vmax.f32 %v580_v50, 0.0 }
 0x2e0   : > { %v587_v56 = vmax.f32 %v583_v53, 0.0 }
 0x2e2   : > { %v605_v57 = vpack.c.bf16 %v587_v56, %v586_v55 }
 0x2e4   : > { %952 = vmatmul.mubr.bf16.vlgmr.msra.gmra.mrb[4].mxu0 %v605_v57 }
 0x3b7   : > { %v694_v59 = vpop.f32.mrb[4].mxu0 }
 0x3b8   : > { %v695_v60 = vadd.f32 %v852_v58, %v694_v59  ;;  %v953_v61 = vpop.f32.mrb[5].mxu0 }
 0x3b9   : > { %v697_v62 = vpop.f32.mrb[6].mxu0 }
 0x3ba   : > { %701 = vst [vmem:[%s340_s15] sm:$0xff] %v695_v60  ;;  %v698_v63 = vadd.f32 %v852_v58, %v697_v62  ;;  %v954_v0 = vpop.f32.mrb[7].mxu0 }
 0x3bc   : > { %702 = vst [vmem:[%s340_s15 + $0x8] sm:$0xff] %v698_v63 }
 0x3bd   : > { %1195 = shalt.err (!%p1192_p4)
}
 0x3be   : > { %s1196_s23 = scalar_lea.hbm %s1577_s13, 256  ;;  %s1200_s14 = scalar_lea.hbm %s1627_s7, 768 }
 0x3bf   : > { %p1197_p9 = scmp.ne.s32.totalorder %s1577_s13, %s1196_s23  ;;  %p1201_p8 = scmp.lt.u32.totalorder %s1577_s13, %s1627_s7 }
 0x3c0   : > { %p1202_p12 = scmp.lt.u32.totalorder %s1200_s14, %s1196_s23  ;;  %p1204_p0 = scmp.lt.u32.totalorder %s1196_s23, %s1577_s13 }
 0x3c1   : > { %p1198_p13 = pnand %p1197_p9, %p1464_p5 }
 0x3c2   : > { %p1203_p6 = por %p1202_p12, %p1201_p8 }
 0x3c3   : > { %p1199_p10 = pneg %p1198_p13 }
 0x3c4   : > { %p1205_p3 = por %p1204_p0, %p1203_p6 }
 0x3c6   : > { %p1206_p7 = pnand %p1205_p3, %p1199_p10 }
 0x3c8   : > { %1209 = shalt.err (!%p1206_p7)
}
 0x3c9   : > { %s1269_s8 = smov 128   ;;  %s1270_s17 = smov 8  }
 0x3ca   : > { %969 = dma.vmem_to_hbm [thread:$0]  (%p1464_p5), %s1572_s29, 256, %s1577_s13, %s704_s16, %s1269_s8, %s1269_s8, %s1270_s17  }
 0x3cb PF: > { %s1647_s28 = sld [smem:[#allocation15_spill]]  ;;  %p996_p11 = scmp.ge.s32.totalorder %s1256_s27, 2 }
 0x3cc   : > { %s732_s20 = sand.u32 1, %s1244_s24  }
 0x3cd   : > { %s733_s30 = scalar_lea.sflag [#allocation4], %s732_s20 }
 0x3d1   : > { %p1648_p1 = scmp.ne.s32.totalorder %s1647_s28, 0 }
 0x3d3   : > { %p986_p2 = pnand %p996_p11, %p1648_p1 }
 0x3d5   : > { %1239 = dma.done.wait (!%p986_p2), %s733_s30, 256  }
 0x3d6   : > { %1241 = vsyncadd (!%p986_p2), %s733_s30, 4294967040  ;;  %p22_p4 = scmp.ge.s32.totalorder %s1450_s22, 5   ;;  %s1649_s24 = smov %s1248_s25 }
 0x3d7   : > { %s1650_s25 = smov %s1252_s26  ;;  %s1651_s26 = smov %s1460_s18 }
 0x3d8   : > { %s1652_s27 = smov %s1450_s22  ;;  %24 = sbr.rel (!%p22_p4) target bundleno = 7 (0x7), region = 105 }
 0x3df   :  { %738 = vsyncpa [#allocation3], 1 }
 0x3e0   :  { %740 = vsyncpa [#allocation3 + $0x1], 1 }
 0x3e1   :  { %741 = vsyncpa [#allocation6], 1 }
 0x3e2   :  { %742 = vsyncpa [#allocation9], 1 }
 0x3e3   :  { %743 = vsyncpa [#allocation4], 1 }
 0x3e4   :  { %745 = vsyncpa [#allocation4 + $0x1], 1 }

</bundles_post_ra>
